<compile_context>
chip_gen: v6e
topology: v6e:2x2x1
jax: 0.10.0
libtpu: 0.0.40
codegen_flags: <defaults>
</compile_context>

<pallas_src>
import jax
import jax.numpy as jnp
from jax.experimental import pallas as pl
from jax.experimental.pallas import tpu as pltpu

_LANE = 128
# Per-grid-step x+out payload target (amortizes the ~0.35 us/step overhead
# even at v7x's 3.2 TB/s HBM bandwidth).
_TARGET_STEP_BYTES = 2 << 20


def _round_up(x, m):
    return (x + m - 1) // m * m


def _largest_divisor_leq(total, cap):
    """Largest divisor of `total` that is <= cap (always >= 1)."""
    cap = max(1, min(cap, total))
    best = 1
    d = 1
    while d * d <= total:
        if total % d == 0:
            lo, hi = d, total // d
            if lo <= cap:
                best = max(best, lo)
            if hi <= cap:
                best = max(best, hi)
        d += 1
    return best


def _plan_tiles(N, Cin, Cout, HW_pad, x_bytes, out_bytes):
    """Pick (bn, t_hw, vmem_limit_bytes) from a byte target + VMEM budget."""
    try:
        vmem_phys = int(pltpu.get_tpu_info().vmem_capacity_bytes)
    except Exception:
        vmem_phys = 64 << 20                       # conservative (v7x per-core)
    # Scoped VMEM we ask Mosaic for: 3/4 of physical (96 MiB on v5e/v6e,
    # 48 MiB on v7x), leaving headroom for compiler-internal scratch.
    vmem_limit = max(32 << 20, min((vmem_phys * 3) // 4, 96 << 20))
    # Budget for the double-buffered x+out blocks (weights/bias are tiny).
    block_budget = vmem_limit // 3

    per_hw_bytes = Cin * x_bytes + Cout * out_bytes    # x+out bytes per pixel
    hw_blocks = HW_pad // _LANE

    # Spatial tile: largest 128-multiple divisor of HW_pad under both caps.
    cap_target = max(1, (4 * _TARGET_STEP_BYTES) // (per_hw_bytes * _LANE))
    cap_vmem = max(1, block_budget // (2 * per_hw_bytes * _LANE))
    t_hw = _LANE * _largest_divisor_leq(hw_blocks, min(cap_target, cap_vmem))

    # Batch block: fold images into the step until the byte target is met
    # (matters for small H*W, where a single image's tile is only KiBs).
    step_bytes = per_hw_bytes * t_hw
    bn_cap = min(max(1, _TARGET_STEP_BYTES // step_bytes),
                 max(1, block_budget // (2 * step_bytes)))
    bn = _largest_divisor_leq(N, bn_cap)

    # Megacore: expose at least 2 grid steps along the "parallel" axes
    # whenever the problem size allows it (v7x has 2 TensorCores per chip).
    if (N // bn) * (HW_pad // t_hw) < 2:
        if N > 1 and bn > 1:
            bn = _largest_divisor_leq(N, bn // 2)
        elif N == 1 and hw_blocks > 1:
            t_hw = _LANE * _largest_divisor_leq(hw_blocks, (t_hw // _LANE) // 2)
    return bn, t_hw, vmem_limit


def _pointwise_kernel(x_ref, w_ref, b_ref, o_ref):
    # x_ref: (bn, Cin, t_hw)   w_ref: (Cout, Cin)   b_ref: (Cout, 1) f32
    # o_ref: (bn, Cout, t_hw)
    w = w_ref[...]
    b = b_ref[...]                     # broadcasts over the lane (HW) dim

    @pl.loop(0, x_ref.shape[0])        # per image in the batch block
    def _(i):
        # (Cout, Cin) @ (Cin, t_hw) -> f32 accumulator; lane-dense store.
        # Default matmul precision is used; with the small Cin here parity
        # with f32 conv is within 1e-5 (use Precision.HIGHEST for large Cin).
        acc = jnp.dot(w, x_ref[i], preferred_element_type=jnp.float32)
        o_ref[i] = (acc + b).astype(o_ref.dtype)


@jax.jit
def pointwise_conv2d(x, k, b=None):
    """Equivalent of F.conv2d(x, k, bias=b) for a 1x1 kernel.

    x: (N, Cin, H, W)   k: (Cout, Cin, 1, 1)   b: (Cout,) or None
    returns (N, Cout, H, W)
    """
    N, Cin, H, W = x.shape
    Cout = k.shape[0]
    HW = H * W
    HW_pad = _round_up(HW, _LANE)

    # Layout plumbing only: contiguity-preserving reshapes (no transposes).
    w = k.reshape(Cout, Cin)
    xr = x.reshape(N, Cin, HW)
    if HW_pad != HW:
        # Keep the output lane dim a multiple of 128 (unmasked vst) instead
        # of masked partial stores; padded columns are sliced off below.
        xr = jnp.pad(xr, ((0, 0), (0, 0), (0, HW_pad - HW)))
    bias = (jnp.zeros((Cout,), jnp.float32) if b is None
            else b.astype(jnp.float32))
    bias2d = bias.reshape(Cout, 1)

    x_bytes = x.dtype.itemsize
    out_bytes = x.dtype.itemsize
    bn, t_hw, vmem_limit = _plan_tiles(N, Cin, Cout, HW_pad, x_bytes, out_bytes)
    grid = (N // bn, HW_pad // t_hw)

    cost = pl.CostEstimate(
        flops=2 * N * HW_pad * Cin * Cout,
        transcendentals=0,
        bytes_accessed=(N * HW_pad * (Cin * x_bytes + Cout * out_bytes)
                        + Cout * Cin * k.dtype.itemsize + Cout * 4),
    )

    out = pl.pallas_call(
        _pointwise_kernel,
        out_shape=jax.ShapeDtypeStruct((N, Cout, HW_pad), x.dtype),
        grid_spec=pltpu.PrefetchScalarGridSpec(
            num_scalar_prefetch=0,
            grid=grid,
            in_specs=[
                pl.BlockSpec((bn, Cin, t_hw), lambda n, j: (n, 0, j)),   # x
                pl.BlockSpec((Cout, Cin), lambda n, j: (0, 0)),          # weight
                pl.BlockSpec((Cout, 1), lambda n, j: (0, 0)),            # f32 bias
            ],
            out_specs=pl.BlockSpec((bn, Cout, t_hw), lambda n, j: (n, 0, j)),
        ),
        compiler_params=pltpu.CompilerParams(
            dimension_semantics=("parallel", "parallel"),
            vmem_limit_bytes=vmem_limit,
        ),
        cost_estimate=cost,
    )(xr, w, bias2d)

    if HW_pad != HW:
        out = out[:, :, :HW]
    return out.reshape(N, Cout, H, W)


if __name__ == "__main__":
    key = jax.random.PRNGKey(0)
    k_x, k_w, k_x2 = jax.random.split(key, 3)

    # Module config: inplanes=4, planes=8, bias=True
    N, Cin, H, W = 2, 4, 16, 16
    Cout = 8

    x = jax.random.normal(k_x, (N, Cin, H, W), dtype=jnp.float32)
    # torch.randn(planes, inplanes, 1, 1) -> deterministic normal init here.
    kern = jax.random.normal(k_w, (Cout, Cin, 1, 1), dtype=jnp.float32)
    # torch.zeros(planes)
    bias = jnp.zeros((Cout,), dtype=jnp.float32)

    out = jax.block_until_ready(pointwise_conv2d(x, kern, bias))
    ref = (jnp.einsum("nchw,oc->nohw", x, kern.reshape(Cout, Cin))
           + bias[None, :, None, None])
    assert out.shape == (N, Cout, H, W), out.shape
    assert jnp.allclose(out, ref, atol=1e-5, rtol=1e-5), \
        float(jnp.max(jnp.abs(out - ref)))

    # bias=None path.
    out_nb = jax.block_until_ready(pointwise_conv2d(x, kern, None))
    ref_nb = jnp.einsum("nchw,oc->nohw", x, kern.reshape(Cout, Cin))
    assert jnp.allclose(out_nb, ref_nb, atol=1e-5, rtol=1e-5)

    # Exercise padded-HW (64 -> 128) + batch-folding (bn > 1) path.
    N2, H2, W2 = 8, 8, 8
    x2 = jax.random.normal(k_x2, (N2, Cin, H2, W2), dtype=jnp.float32)
    out2 = jax.block_until_ready(pointwise_conv2d(x2, kern, bias))
    ref2 = (jnp.einsum("nchw,oc->nohw", x2, kern.reshape(Cout, Cin))
            + bias[None, :, None, None])
    assert jnp.allclose(out2, ref2, atol=1e-5, rtol=1e-5)

    print("KERNEL_OK")
</pallas_src>

<mosaic_0001>
module attributes {stable_mosaic.version = 11 : i64} {
  func.func @_pointwise_kernel(%arg0: i32, %arg1: i32, %arg2: memref<1x4x256xf32, #tpu.memory_space<vmem>>, %arg3: memref<8x4xf32, #tpu.memory_space<vmem>>, %arg4: memref<8x1xf32, #tpu.memory_space<vmem>>, %arg5: memref<1x8x256xf32, #tpu.memory_space<vmem>>) attributes {dimension_semantics = [#tpu.dimension_semantics<parallel>, #tpu.dimension_semantics<parallel>], iteration_bounds = array<i64: 2, 1>, scalar_prefetch = 0 : i64, scratch_operands = 0 : i64, tpu.core_type = #tpu.core_type<tc>, window_params = [{transform_indices = @transform_0, window_bounds = array<i64: 1, 4, 256>}, {pipeline_mode = #tpu.pipeline_mode<synchronous>, transform_indices = @transform_1, window_bounds = array<i64: 8, 4>}, {pipeline_mode = #tpu.pipeline_mode<synchronous>, transform_indices = @transform_2, window_bounds = array<i64: 8, 1>}, {transform_indices = @transform_3, window_bounds = array<i64: 1, 8, 256>}]} {
    %c0 = arith.constant 0 : index
    %c0_0 = arith.constant 0 : index
    %0 = vector.load %arg3[%c0, %c0_0] : memref<8x4xf32, #tpu.memory_space<vmem>>, vector<8x4xf32>
    %c0_1 = arith.constant 0 : index
    %c0_2 = arith.constant 0 : index
    %1 = vector.load %arg4[%c0_1, %c0_2] : memref<8x1xf32, #tpu.memory_space<vmem>>, vector<8x1xf32>
    %c0_i32 = arith.constant 0 : i32
    %c1_i32 = arith.constant 1 : i32
    %2 = arith.muli %c0_i32, %c1_i32 : i32
    %c0_i32_3 = arith.constant 0 : i32
    %3 = arith.addi %c0_i32_3, %2 : i32
    %4 = arith.index_cast %3 : i32 to index
    %c0_4 = arith.constant 0 : index
    %c0_5 = arith.constant 0 : index
    %5 = vector.load %arg2[%4, %c0_4, %c0_5] : memref<1x4x256xf32, #tpu.memory_space<vmem>>, vector<1x4x256xf32>
    %6 = vector.shape_cast %5 : vector<1x4x256xf32> to vector<4x256xf32>
    %cst = arith.constant dense<0.000000e+00> : vector<8x256xf32>
    %7 = tpu.matmul %0, %6, %cst {dimension_numbers = #tpu.dot_dimension_numbers<[1], [0], [0], [1], [0, 0, 1, 1], [], []>} : vector<8x4xf32>, vector<4x256xf32>, vector<8x256xf32> -> vector<8x256xf32>
    %8 = vector.broadcast %1 : vector<8x1xf32> to vector<8x256xf32>
    %9 = arith.addf %7, %8 : vector<8x256xf32>
    %10 = arith.index_cast %3 : i32 to index
    %c0_6 = arith.constant 0 : index
    %c0_7 = arith.constant 0 : index
    %11 = vector.load %arg5[%10, %c0_6, %c0_7] : memref<1x8x256xf32, #tpu.memory_space<vmem>>, vector<1x8x256xf32>
    %12 = vector.shape_cast %11 : vector<1x8x256xf32> to vector<8x256xf32>
    %13 = vector.shape_cast %9 : vector<8x256xf32> to vector<1x8x256xf32>
    tpu.vector_store %arg5[%10, %c0_6, %c0_7], %13 {strides = array<i32>} : memref<1x8x256xf32, #tpu.memory_space<vmem>>, vector<1x8x256xf32>,
    %c1_i32_8 = arith.constant 1 : i32
    return
  }
  func.func @transform_0(%arg0: i32, %arg1: i32) -> (i32, i32, i32) {
    %c0_i32 = arith.constant 0 : i32
    %c0_i32_0 = arith.constant 0 : i32
    return %arg0, %c0_i32, %arg1 : i32, i32, i32
  }
  func.func @transform_1(%arg0: i32, %arg1: i32) -> (i32, i32) {
    %c0_i32 = arith.constant 0 : i32
    %c0_i32_0 = arith.constant 0 : i32
    %c0_i32_1 = arith.constant 0 : i32
    return %c0_i32, %c0_i32_0 : i32, i32
  }
  func.func @transform_2(%arg0: i32, %arg1: i32) -> (i32, i32) {
    %c0_i32 = arith.constant 0 : i32
    %c0_i32_0 = arith.constant 0 : i32
    %c0_i32_1 = arith.constant 0 : i32
    return %c0_i32, %c0_i32_0 : i32, i32
  }
  func.func @transform_3(%arg0: i32, %arg1: i32) -> (i32, i32, i32) {
    %c0_i32 = arith.constant 0 : i32
    %c0_i32_0 = arith.constant 0 : i32
    return %arg0, %c0_i32, %arg1 : i32, i32, i32
  }
}

</mosaic_0001>

<bundles_post_ra>
// kernel: pointwise_conv2d.1
= control target key start
LH: loop header
LB: loop body
LE: loop exit
PB: predicated region body
PF: predicated region fallthrough
CT: control target
= control target key end

     0   :  { %s479_s12 = smov 0   ;;  %s481_s13 = smov 0   ;;  %s518_s0 = inlined_call_operand.vmem [shape: f32[2,4,256], index: 0, kind: input, shape index: {}]   ;;  %s519_s1 = inlined_call_operand.vmem [shape: f32[8,4], index: 1, kind: input, shape index: {}]   ;;  %s520_s2 = inlined_call_operand.vmem [shape: f32[8,1], index: 2, kind: input, shape index: {}]   ;;  %s521_s3 = inlined_call_operand.vmem [shape: f32[2,8,256], index: 3, kind: output, shape index: {}]  }
   0x1   :  { %s483_s14 = smov 0  }
   0x2 LB: > { %s25_s15 = sadd.s32 1, %s451_s13  ;;  %p393_p0 = scmp.ge.s32.totalorder %s455_s14, 1  ;;  %s455_s14 = sphi %s483_s14, %s13_s14   ;;  %s451_s13 = sphi %s481_s13, %s523_s13   ;;  %s447_s12 = sphi %s479_s12, %s522_s12  }
   0x3   : > { %p27_p1 = scmp.ge.s32.totalorder %s25_s15, 2  ;;  %p158_p2 = scmp.lt.s32.totalorder %s455_s14, 3 }
   0x5   : > { %s525_s15 = smov (%p27_p1, %s25_s15), 0  ;;  %p159_p3 = pnand %p393_p0, %p158_p2 }
   0x6   : > { %p191_p4 = scmp.lt.s32.totalorder (!%p159_p3), %s447_s12, 1 }
   0x7   : > { %162 = sbr.rel (%p159_p3) target bundleno = 218 (0xda), region = 32 }
   0xc   : > { %v457_v0 = vmov 0.0   ;;  %v458_v1 = vmov 0   ;;  %v211_v2 = vld [vmem:[%s520_s2] sm:$0xff]  ;;  %s527_s12 = smov (!%p191_p4, %s447_s12), 1  ;;  %vm224_vm0 = vcmask 1043456   ;;  %vm220_vm1 = vcmask 31744  }
   0xd   : > { %293 = vmatprep.mubr.f32.mxu0 %v457_v0  ;;  %431 = vset.pattern.permute.xlu0 %v458_v1  ;;  %s403_s18 = sshll.u32 %s527_s12, 3  ;;  %v210_v5 = vld [vmem:[%s519_s1] sm:$0xff]  ;;  %s404_s24 = sshll.u32 %s527_s12, 4 }
   0xe   : > { %215 = vperm.xlu0 %431, %v211_v2   ;;  %s198_s21 = scalar_lea.vmem %s518_s0, %s403_s18  ;;  %s208_s27 = scalar_lea.vmem %s521_s3, %s404_s24 }
   0xf   : > { %v212_v3 = vld [vmem:[%s198_s21] sm:$0xff] }
  0x10   : > { %v219_v4 = vcombine.high %v212_v3, %v212_v3 }
  0x12   : > { %398 = vmatprep.subr.msk.mxu0 %vm224_vm0, %v219_v4 }
  0x13   : > { %399 = vmatpush1.msk.msra.mxu0 %vm224_vm0, %v212_v3 }
  0x14   : > { %400 = vmatmul.mubr.msk.f32.vlgmr.msra.gmra.mxu0 %vm220_vm1, %v210_v5 }
  0x89   : > { %v216_v6 = vpop.permute.xlu0 %215 }
  0xd4   : > { %v295_v7 = vpop.f32.mrf.mxu0 }
  0xd5   : > { %v296_v8 = vadd.f32 %v295_v7, %v216_v6 }
  0xd6   : > { %v297_v9 = vpop.f32.mrf.mxu0 }
  0xd7   : > { %300 = vst [vmem:[%s208_s27] sm:$0xff] %v296_v8  ;;  %v298_v10 = vadd.f32 %v297_v9, %v216_v6 }
  0xd9   : > { %301 = vst [vmem:[%s208_s27 + $0x8] sm:$0xff] %v298_v10 }
  0xda PF: > { %s13_s14 = sadd.s32 1, %s455_s14   ;;  %s522_s12 = smov %s451_s13 }
  0xdb   : > { %p10_p5 = scmp.ge.s32.totalorder %s13_s14, 4   ;;  %s523_s13 = smov %s525_s15 }
  0xdd   :  { %12 = sbr.rel (!%p10_p5) target bundleno = 2 (0x2), region = 62 }

</bundles_post_ra>
